<compile_context>
chip_gen: v6e
topology: v6e:2x2x1
jax: 0.10.0
libtpu: 0.0.40
codegen_flags: <defaults>
</compile_context>

<pallas_src>
import functools

import jax
import jax.numpy as jnp
from jax.experimental import pallas as pl
from jax.experimental.pallas import tpu as pltpu

EPS = 1e-5   # nn.InstanceNorm2d default


def _round_up(a, b):
    return (a + b - 1) // b * b


def _conv3x3_in_relu(x, w_ref, gamma, beta, mask_m, mask_p,
                     W, pad, xw_c, xw_m, xw_p):
    """Conv3x3 (no bias; cancelled by IN) -> InstanceNorm(affine) -> ReLU.

    x:          (C, P) fp32 activation, P = H*W, lane-dense.
    w_ref:      (9, C, C) conv taps (matmul dtype), tap-major (ky, kx).
    gamma/beta: (C, 1) fp32.
    mask_m:     (1, P) kills source column W-1 (used by the dx = -1 taps).
    mask_p:     (1, P) kills source column 0   (used by the dx = +1 taps).
    xw_*:       (C, P + 2*pad) zero-halo staging scratch (matmul dtype).
    """
    C, P = x.shape

    # Stage the activation (single cast to the matmul dtype) into three
    # zero-halo buffers: unmasked, right-column-killed (dx=-1 taps) and
    # left-column-killed (dx=+1 taps).  Pre-masking here removes every
    # per-tap mask multiply / sublane broadcast from the 9-dot loop.
    xb = x.astype(xw_c.dtype)
    xw_c[:, pad:pad + P] = xb
    xw_m[:, pad:pad + P] = xb * mask_m
    xw_p[:, pad:pad + P] = xb * mask_p

    # 9 accumulated MXU dots reading shifted slices directly (no im2col).
    acc = None
    t = 0
    for dy in (-1, 0, 1):
        for dx in (-1, 0, 1):
            src = xw_m if dx == -1 else (xw_p if dx == 1 else xw_c)
            s = dy * W + dx
            piece = src[:, pad + s:pad + s + P]               # (C, P)
            d = jnp.dot(w_ref[t], piece, preferred_element_type=jnp.float32)
            acc = d if acc is None else acc + d
            t += 1

    # InstanceNorm2d: one-pass moments (fp32), gamma folded into the rsqrt
    # scale -> a single (C, P) multiply + add afterwards, then ReLU.
    inv_p = 1.0 / P
    s1 = jnp.sum(acc, axis=1, keepdims=True)
    s2 = jnp.sum(acc * acc, axis=1, keepdims=True)
    mean = s1 * inv_p
    var = jnp.maximum(s2 * inv_p - mean * mean, 0.0)
    scale = gamma * jax.lax.rsqrt(var + EPS)
    shift = beta - mean * scale
    return jnp.maximum(acc * scale + shift, 0.0)


def residual_block_in_kernel(x_ref, w1_ref, g1_ref, be1_ref,
                             w2_ref, g2_ref, be2_ref, cm_ref,
                             o_ref, xw_c, xw_m, xw_p, *, W, pad):
    C = o_ref.shape[1]
    P = o_ref.shape[2]

    # Zero only the halo borders of the three staging buffers.  The interior
    # is always fully overwritten; done every step so correctness does not
    # depend on how the "parallel" batch axis is split across TensorCores.
    zb = jnp.zeros((C, pad), xw_c.dtype)
    for buf in (xw_c, xw_m, xw_p):
        buf[:, 0:pad] = zb
        buf[:, pad + P:pad + P + pad] = zb

    mask_m = cm_ref[0:1, :]    # (1, P): zero where src col == W-1 (dx=-1 taps)
    mask_p = cm_ref[1:2, :]    # (1, P): zero where src col == 0   (dx=+1 taps)

    out1 = _conv3x3_in_relu(x_ref[0], w1_ref, g1_ref[...], be1_ref[...],
                            mask_m, mask_p, W, pad, xw_c, xw_m, xw_p)
    out2 = _conv3x3_in_relu(out1, w2_ref, g2_ref[...], be2_ref[...],
                            mask_m, mask_p, W, pad, xw_c, xw_m, xw_p)

    # Residual add: reload x here instead of carrying it live across both
    # convs (bounds the live range of the (C, P) fp32 value).
    o_ref[0] = x_ref[0] + out2


def residual_block_in(x_nchw, params, *, matmul_dtype=jnp.bfloat16):
    """Forward pass of ResidualBlock_IN.

    x_nchw: (N, C, H, W) float32.
    params: (w1, b1, g1, be1, w2, b2, g2, be2); conv weights in PyTorch OIHW
            layout (C, C, 3, 3), 1-D (C,) bias / affine vectors.
    matmul_dtype: bf16 by default (fp32 accumulation; InstanceNorm
            renormalizes so accuracy impact is negligible).
    """
    w1, b1, g1, be1, w2, b2, g2, be2 = params
    # The per-channel conv bias is exactly cancelled by InstanceNorm's mean
    # subtraction, so it is dropped entirely (dead work otherwise).
    del b1, b2

    N, C, H, W = x_nchw.shape
    P = H * W
    itemsize = jnp.dtype(matmul_dtype).itemsize
    sub = 16 if itemsize < 4 else 8          # full sublane pack per dtype
    Cp = _round_up(C, sub)
    pad = _round_up(W + 1, 128)              # halo must cover +-(W+1) offsets

    # NCHW -> (N, C, H*W): pure reshape, lane-dense.  Channel padding is a
    # no-op for nf that is already a multiple of the sublane pack (e.g. 64).
    x_flat = x_nchw.reshape(N, C, P).astype(jnp.float32)
    if Cp != C:
        x_flat = jnp.pad(x_flat, ((0, 0), (0, Cp - C), (0, 0)))

    def prep_w(w):   # OIHW (C,C,3,3) -> (9, Cp, Cp), tap-major (ky, kx)
        wt = jnp.transpose(w, (2, 3, 0, 1)).reshape(9, C, C)
        wt = jnp.pad(wt, ((0, 0), (0, Cp - C), (0, Cp - C)))
        return wt.astype(matmul_dtype)

    def prep_v(v):   # (C,) -> (Cp, 1) fp32, zero padded (padded ch -> 0 out)
        return jnp.pad(v.astype(jnp.float32), (0, Cp - C)).reshape(Cp, 1)

    w1_9, w2_9 = prep_w(w1), prep_w(w2)
    g1_c, be1_c = prep_v(g1), prep_v(be1)
    g2_c, be2_c = prep_v(g2), prep_v(be2)

    # Source-column validity masks (kill wrap-around of the dx = -1 / +1 taps
    # across image rows).  Shared by both convs.
    col = jnp.arange(P, dtype=jnp.int32) % W
    cmask = jnp.stack([(col <= W - 2),        # for dx = -1 taps
                       (col >= 1)],           # for dx = +1 taps
                      axis=0).astype(matmul_dtype)

    def const_spec(shape):
        nd = len(shape)
        return pl.BlockSpec(shape, lambda i, _n=nd: (0,) * _n)

    kernel = functools.partial(residual_block_in_kernel, W=W, pad=pad)

    # Explicit VMEM budget from the actual block / scratch sizes (+ headroom
    # for compiler temporaries), clamped to stay within physical limits.
    block_bytes = Cp * P * 4
    scratch_bytes = 3 * Cp * (P + 2 * pad) * itemsize
    const_bytes = 2 * 9 * Cp * Cp * itemsize + 4 * Cp * 4 + 2 * P * itemsize
    est = (2 + 2 + 4) * block_bytes + scratch_bytes + 2 * const_bytes
    vmem_limit = int(max(32 * 1024 * 1024,
                         min(int(est * 1.5), 100 * 1024 * 1024)))

    flops = int(N * 2 * 2 * 9 * Cp * Cp * P)          # 2 convs, MAC = 2 flops
    bytes_accessed = int(4 * 2 * N * Cp * P
                         + 2 * 9 * Cp * Cp * itemsize
                         + 4 * 4 * Cp + 2 * P * itemsize)

    out_flat = pl.pallas_call(
        kernel,
        out_shape=jax.ShapeDtypeStruct((N, Cp, P), jnp.float32),
        grid_spec=pltpu.PrefetchScalarGridSpec(
            num_scalar_prefetch=0,
            grid=(N,),
            in_specs=[
                pl.BlockSpec((1, Cp, P), lambda i: (i, 0, 0)),   # x
                const_spec((9, Cp, Cp)),                         # w1 taps
                const_spec((Cp, 1)), const_spec((Cp, 1)),        # g1, be1
                const_spec((9, Cp, Cp)),                         # w2 taps
                const_spec((Cp, 1)), const_spec((Cp, 1)),        # g2, be2
                const_spec((2, P)),                              # cmask
            ],
            out_specs=pl.BlockSpec((1, Cp, P), lambda i: (i, 0, 0)),
            scratch_shapes=[
                pltpu.VMEM((Cp, P + 2 * pad), matmul_dtype),     # unmasked
                pltpu.VMEM((Cp, P + 2 * pad), matmul_dtype),     # dx=-1 taps
                pltpu.VMEM((Cp, P + 2 * pad), matmul_dtype),     # dx=+1 taps
            ],
        ),
        compiler_params=pltpu.CompilerParams(
            dimension_semantics=("parallel",),
            vmem_limit_bytes=vmem_limit),
        cost_estimate=pl.CostEstimate(
            flops=flops,
            transcendentals=int(2 * N * Cp),
            bytes_accessed=bytes_accessed),
    )(x_flat, w1_9, g1_c, be1_c, w2_9, g2_c, be2_c, cmask)

    return out_flat[:, :C, :].reshape(N, C, H, W)


# ----------------------------- pure-JAX reference -----------------------------
def residual_block_in_reference(x_nchw, params):
    w1, b1, g1, be1, w2, b2, g2, be2 = params
    x = x_nchw.astype(jnp.float32)

    def conv(inp, w, b):
        out = jax.lax.conv_general_dilated(
            inp, w, window_strides=(1, 1), padding="SAME",
            dimension_numbers=("NCHW", "OIHW", "NCHW"))
        return out + b.reshape(1, -1, 1, 1)

    def inorm(inp, gamma, beta):
        mean = jnp.mean(inp, axis=(2, 3), keepdims=True)
        var = jnp.mean(jnp.square(inp - mean), axis=(2, 3), keepdims=True)
        return ((inp - mean) * jax.lax.rsqrt(var + EPS)
                * gamma.reshape(1, -1, 1, 1) + beta.reshape(1, -1, 1, 1))

    out = jnp.maximum(inorm(conv(x, w1, b1), g1, be1), 0.0)
    out = jnp.maximum(inorm(conv(out, w2, b2), g2, be2), 0.0)
    return x + out


if __name__ == "__main__":
    N, C, H, W = 2, 4, 16, 16   # small shapes; nf (= C) = 4 for the example

    key = jax.random.PRNGKey(0)
    ks = jax.random.split(key, 9)

    x = jax.random.normal(ks[0], (N, C, H, W), jnp.float32)

    w1 = 0.1 * jax.random.normal(ks[1], (C, C, 3, 3), jnp.float32)
    b1 = 0.1 * jax.random.normal(ks[2], (C,), jnp.float32)
    g1 = 1.0 + 0.1 * jax.random.normal(ks[3], (C,), jnp.float32)
    be1 = 0.1 * jax.random.normal(ks[4], (C,), jnp.float32)
    w2 = 0.1 * jax.random.normal(ks[5], (C, C, 3, 3), jnp.float32)
    b2 = 0.1 * jax.random.normal(ks[6], (C,), jnp.float32)
    g2 = 1.0 + 0.1 * jax.random.normal(ks[7], (C,), jnp.float32)
    be2 = 0.1 * jax.random.normal(ks[8], (C,), jnp.float32)

    params = (w1, b1, g1, be1, w2, b2, g2, be2)

    ref = jax.block_until_ready(residual_block_in_reference(x, params))

    # 1) fp32-matmul path: tight check of the kernel logic.
    out_fp32 = jax.block_until_ready(
        jax.jit(functools.partial(residual_block_in,
                                  matmul_dtype=jnp.float32))(x, params))
    assert out_fp32.shape == (N, C, H, W)
    assert jnp.allclose(out_fp32, ref, atol=1e-3, rtol=1e-3), (
        f"fp32 max abs err {jnp.max(jnp.abs(out_fp32 - ref))}")

    # 2) default bf16-matmul path (perf config): looser tolerance.
    out_bf16 = jax.block_until_ready(jax.jit(residual_block_in)(x, params))
    assert out_bf16.shape == (N, C, H, W)
    assert jnp.allclose(out_bf16, ref, atol=3e-2, rtol=3e-2), (
        f"bf16 max abs err {jnp.max(jnp.abs(out_bf16 - ref))}")

    print("KERNEL_OK")
</pallas_src>

<mosaic_0001>
module attributes {stable_mosaic.version = 11 : i64} {
  func.func @residual_block_in_kernel(%arg0: i32, %arg1: memref<1x8x256xf32, #tpu.memory_space<vmem>>, %arg2: memref<9x8x8xf32, #tpu.memory_space<vmem>>, %arg3: memref<8x1xf32, #tpu.memory_space<vmem>>, %arg4: memref<8x1xf32, #tpu.memory_space<vmem>>, %arg5: memref<9x8x8xf32, #tpu.memory_space<vmem>>, %arg6: memref<8x1xf32, #tpu.memory_space<vmem>>, %arg7: memref<8x1xf32, #tpu.memory_space<vmem>>, %arg8: memref<2x256xf32, #tpu.memory_space<vmem>>, %arg9: memref<1x8x256xf32, #tpu.memory_space<vmem>>, %arg10: memref<8x512xf32, #tpu.memory_space<vmem>>, %arg11: memref<8x512xf32, #tpu.memory_space<vmem>>, %arg12: memref<8x512xf32, #tpu.memory_space<vmem>>) attributes {dimension_semantics = [#tpu.dimension_semantics<parallel>], iteration_bounds = array<i64: 2>, scalar_prefetch = 0 : i64, scratch_operands = 3 : i64, tpu.core_type = #tpu.core_type<tc>, window_params = [{transform_indices = @transform_0, window_bounds = array<i64: 1, 8, 256>}, {pipeline_mode = #tpu.pipeline_mode<synchronous>, transform_indices = @transform_1, window_bounds = array<i64: 9, 8, 8>}, {pipeline_mode = #tpu.pipeline_mode<synchronous>, transform_indices = @transform_2, window_bounds = array<i64: 8, 1>}, {pipeline_mode = #tpu.pipeline_mode<synchronous>, transform_indices = @transform_3, window_bounds = array<i64: 8, 1>}, {pipeline_mode = #tpu.pipeline_mode<synchronous>, transform_indices = @transform_4, window_bounds = array<i64: 9, 8, 8>}, {pipeline_mode = #tpu.pipeline_mode<synchronous>, transform_indices = @transform_5, window_bounds = array<i64: 8, 1>}, {pipeline_mode = #tpu.pipeline_mode<synchronous>, transform_indices = @transform_6, window_bounds = array<i64: 8, 1>}, {pipeline_mode = #tpu.pipeline_mode<synchronous>, transform_indices = @transform_7, window_bounds = array<i64: 2, 256>}, {transform_indices = @transform_8, window_bounds = array<i64: 1, 8, 256>}]} {
    %cst = arith.constant 0.000000e+00 : f32
    %0 = vector.broadcast %cst : f32 to vector<8x128xf32>
    %c0 = arith.constant 0 : index
    %c0_0 = arith.constant 0 : index
    %1 = vector.load %arg10[%c0, %c0_0] : memref<8x512xf32, #tpu.memory_space<vmem>>, vector<8x128xf32>
    tpu.vector_store %arg10[%c0, %c0_0], %0 {strides = array<i32>} : memref<8x512xf32, #tpu.memory_space<vmem>>, vector<8x128xf32>,
    %c0_1 = arith.constant 0 : index
    %c384 = arith.constant 384 : index
    %2 = vector.load %arg10[%c0_1, %c384] : memref<8x512xf32, #tpu.memory_space<vmem>>, vector<8x128xf32>
    tpu.vector_store %arg10[%c0_1, %c384], %0 {strides = array<i32>} : memref<8x512xf32, #tpu.memory_space<vmem>>, vector<8x128xf32>,
    %c0_2 = arith.constant 0 : index
    %c0_3 = arith.constant 0 : index
    %3 = vector.load %arg11[%c0_2, %c0_3] : memref<8x512xf32, #tpu.memory_space<vmem>>, vector<8x128xf32>
    tpu.vector_store %arg11[%c0_2, %c0_3], %0 {strides = array<i32>} : memref<8x512xf32, #tpu.memory_space<vmem>>, vector<8x128xf32>,
    %c0_4 = arith.constant 0 : index
    %c384_5 = arith.constant 384 : index
    %4 = vector.load %arg11[%c0_4, %c384_5] : memref<8x512xf32, #tpu.memory_space<vmem>>, vector<8x128xf32>
    tpu.vector_store %arg11[%c0_4, %c384_5], %0 {strides = array<i32>} : memref<8x512xf32, #tpu.memory_space<vmem>>, vector<8x128xf32>,
    %c0_6 = arith.constant 0 : index
    %c0_7 = arith.constant 0 : index
    %5 = vector.load %arg12[%c0_6, %c0_7] : memref<8x512xf32, #tpu.memory_space<vmem>>, vector<8x128xf32>
    tpu.vector_store %arg12[%c0_6, %c0_7], %0 {strides = array<i32>} : memref<8x512xf32, #tpu.memory_space<vmem>>, vector<8x128xf32>,
    %c0_8 = arith.constant 0 : index
    %c384_9 = arith.constant 384 : index
    %6 = vector.load %arg12[%c0_8, %c384_9] : memref<8x512xf32, #tpu.memory_space<vmem>>, vector<8x128xf32>
    tpu.vector_store %arg12[%c0_8, %c384_9], %0 {strides = array<i32>} : memref<8x512xf32, #tpu.memory_space<vmem>>, vector<8x128xf32>,
    %c0_10 = arith.constant 0 : index
    %c0_11 = arith.constant 0 : index
    %7 = vector.load %arg8[%c0_10, %c0_11] : memref<2x256xf32, #tpu.memory_space<vmem>>, vector<1x256xf32>
    %c1 = arith.constant 1 : index
    %c0_12 = arith.constant 0 : index
    %8 = vector.load %arg8[%c1, %c0_12] : memref<2x256xf32, #tpu.memory_space<vmem>>, vector<1x256xf32>
    %c0_13 = arith.constant 0 : index
    %c0_14 = arith.constant 0 : index
    %c0_15 = arith.constant 0 : index
    %9 = vector.load %arg1[%c0_13, %c0_14, %c0_15] : memref<1x8x256xf32, #tpu.memory_space<vmem>>, vector<1x8x256xf32>
    %10 = vector.shape_cast %9 : vector<1x8x256xf32> to vector<8x256xf32>
    %c0_16 = arith.constant 0 : index
    %c0_17 = arith.constant 0 : index
    %11 = vector.load %arg3[%c0_16, %c0_17] : memref<8x1xf32, #tpu.memory_space<vmem>>, vector<8x1xf32>
    %c0_18 = arith.constant 0 : index
    %c0_19 = arith.constant 0 : index
    %12 = vector.load %arg4[%c0_18, %c0_19] : memref<8x1xf32, #tpu.memory_space<vmem>>, vector<8x1xf32>
    %c0_20 = arith.constant 0 : index
    %c128 = arith.constant 128 : index
    %13 = vector.load %arg10[%c0_20, %c128] : memref<8x512xf32, #tpu.memory_space<vmem>>, vector<8x256xf32>
    tpu.vector_store %arg10[%c0_20, %c128], %10 {strides = array<i32>} : memref<8x512xf32, #tpu.memory_space<vmem>>, vector<8x256xf32>,
    %14 = vector.broadcast %7 : vector<1x256xf32> to vector<8x256xf32>
    %15 = arith.mulf %10, %14 : vector<8x256xf32>
    %c0_21 = arith.constant 0 : index
    %c128_22 = arith.constant 128 : index
    %16 = vector.load %arg11[%c0_21, %c128_22] : memref<8x512xf32, #tpu.memory_space<vmem>>, vector<8x256xf32>
    tpu.vector_store %arg11[%c0_21, %c128_22], %15 {strides = array<i32>} : memref<8x512xf32, #tpu.memory_space<vmem>>, vector<8x256xf32>,
    %17 = vector.broadcast %8 : vector<1x256xf32> to vector<8x256xf32>
    %18 = arith.mulf %10, %17 : vector<8x256xf32>
    %c0_23 = arith.constant 0 : index
    %c128_24 = arith.constant 128 : index
    %19 = vector.load %arg12[%c0_23, %c128_24] : memref<8x512xf32, #tpu.memory_space<vmem>>, vector<8x256xf32>
    tpu.vector_store %arg12[%c0_23, %c128_24], %18 {strides = array<i32>} : memref<8x512xf32, #tpu.memory_space<vmem>>, vector<8x256xf32>,
    %c0_25 = arith.constant 0 : index
    %c111 = arith.constant 111 : index
    %20 = vector.load %arg11[%c0_25, %c111] : memref<8x512xf32, #tpu.memory_space<vmem>>, vector<8x256xf32>
    %c0_26 = arith.constant 0 : index
    %c0_27 = arith.constant 0 : index
    %c0_28 = arith.constant 0 : index
    %21 = vector.load %arg2[%c0_26, %c0_27, %c0_28] : memref<9x8x8xf32, #tpu.memory_space<vmem>>, vector<1x8x8xf32>
    %22 = vector.shape_cast %21 : vector<1x8x8xf32> to vector<8x8xf32>
    %cst_29 = arith.constant dense<0.000000e+00> : vector<8x256xf32>
    %23 = tpu.matmul %22, %20, %cst_29 {dimension_numbers = #tpu.dot_dimension_numbers<[1], [0], [0], [1], [0, 0, 1, 1], [], []>} : vector<8x8xf32>, vector<8x256xf32>, vector<8x256xf32> -> vector<8x256xf32>
    %c0_30 = arith.constant 0 : index
    %c112 = arith.constant 112 : index
    %24 = vector.load %arg10[%c0_30, %c112] : memref<8x512xf32, #tpu.memory_space<vmem>>, vector<8x256xf32>
    %c1_31 = arith.constant 1 : index
    %c0_32 = arith.constant 0 : index
    %c0_33 = arith.constant 0 : index
    %25 = vector.load %arg2[%c1_31, %c0_32, %c0_33] : memref<9x8x8xf32, #tpu.memory_space<vmem>>, vector<1x8x8xf32>
    %26 = vector.shape_cast %25 : vector<1x8x8xf32> to vector<8x8xf32>
    %cst_34 = arith.constant dense<0.000000e+00> : vector<8x256xf32>
    %27 = tpu.matmul %26, %24, %cst_34 {dimension_numbers = #tpu.dot_dimension_numbers<[1], [0], [0], [1], [0, 0, 1, 1], [], []>} : vector<8x8xf32>, vector<8x256xf32>, vector<8x256xf32> -> vector<8x256xf32>
    %28 = arith.addf %23, %27 : vector<8x256xf32>
    %c0_35 = arith.constant 0 : index
    %c113 = arith.constant 113 : index
    %29 = vector.load %arg12[%c0_35, %c113] : memref<8x512xf32, #tpu.memory_space<vmem>>, vector<8x256xf32>
    %c2 = arith.constant 2 : index
    %c0_36 = arith.constant 0 : index
    %c0_37 = arith.constant 0 : index
    %30 = vector.load %arg2[%c2, %c0_36, %c0_37] : memref<9x8x8xf32, #tpu.memory_space<vmem>>, vector<1x8x8xf32>
    %31 = vector.shape_cast %30 : vector<1x8x8xf32> to vector<8x8xf32>
    %cst_38 = arith.constant dense<0.000000e+00> : vector<8x256xf32>
    %32 = tpu.matmul %31, %29, %cst_38 {dimension_numbers = #tpu.dot_dimension_numbers<[1], [0], [0], [1], [0, 0, 1, 1], [], []>} : vector<8x8xf32>, vector<8x256xf32>, vector<8x256xf32> -> vector<8x256xf32>
    %33 = arith.addf %28, %32 : vector<8x256xf32>
    %c0_39 = arith.constant 0 : index
    %c127 = arith.constant 127 : index
    %34 = vector.load %arg11[%c0_39, %c127] : memref<8x512xf32, #tpu.memory_space<vmem>>, vector<8x256xf32>
    %c3 = arith.constant 3 : index
    %c0_40 = arith.constant 0 : index
    %c0_41 = arith.constant 0 : index
    %35 = vector.load %arg2[%c3, %c0_40, %c0_41] : memref<9x8x8xf32, #tpu.memory_space<vmem>>, vector<1x8x8xf32>
    %36 = vector.shape_cast %35 : vector<1x8x8xf32> to vector<8x8xf32>
    %cst_42 = arith.constant dense<0.000000e+00> : vector<8x256xf32>
    %37 = tpu.matmul %36, %34, %cst_42 {dimension_numbers = #tpu.dot_dimension_numbers<[1], [0], [0], [1], [0, 0, 1, 1], [], []>} : vector<8x8xf32>, vector<8x256xf32>, vector<8x256xf32> -> vector<8x256xf32>
    %38 = arith.addf %33, %37 : vector<8x256xf32>
    %c0_43 = arith.constant 0 : index
    %c128_44 = arith.constant 128 : index
    %39 = vector.load %arg10[%c0_43, %c128_44] : memref<8x512xf32, #tpu.memory_space<vmem>>, vector<8x256xf32>
    %c4 = arith.constant 4 : index
    %c0_45 = arith.constant 0 : index
    %c0_46 = arith.constant 0 : index
    %40 = vector.load %arg2[%c4, %c0_45, %c0_46] : memref<9x8x8xf32, #tpu.memory_space<vmem>>, vector<1x8x8xf32>
    %41 = vector.shape_cast %40 : vector<1x8x8xf32> to vector<8x8xf32>
    %cst_47 = arith.constant dense<0.000000e+00> : vector<8x256xf32>
    %42 = tpu.matmul %41, %39, %cst_47 {dimension_numbers = #tpu.dot_dimension_numbers<[1], [0], [0], [1], [0, 0, 1, 1], [], []>} : vector<8x8xf32>, vector<8x256xf32>, vector<8x256xf32> -> vector<8x256xf32>
    %43 = arith.addf %38, %42 : vector<8x256xf32>
    %c0_48 = arith.constant 0 : index
    %c129 = arith.constant 129 : index
    %44 = vector.load %arg12[%c0_48, %c129] : memref<8x512xf32, #tpu.memory_space<vmem>>, vector<8x256xf32>
    %c5 = arith.constant 5 : index
    %c0_49 = arith.constant 0 : index
    %c0_50 = arith.constant 0 : index
    %45 = vector.load %arg2[%c5, %c0_49, %c0_50] : memref<9x8x8xf32, #tpu.memory_space<vmem>>, vector<1x8x8xf32>
    %46 = vector.shape_cast %45 : vector<1x8x8xf32> to vector<8x8xf32>
    %cst_51 = arith.constant dense<0.000000e+00> : vector<8x256xf32>
    %47 = tpu.matmul %46, %44, %cst_51 {dimension_numbers = #tpu.dot_dimension_numbers<[1], [0], [0], [1], [0, 0, 1, 1], [], []>} : vector<8x8xf32>, vector<8x256xf32>, vector<8x256xf32> -> vector<8x256xf32>
    %48 = arith.addf %43, %47 : vector<8x256xf32>
    %c0_52 = arith.constant 0 : index
    %c143 = arith.constant 143 : index
    %49 = vector.load %arg11[%c0_52, %c143] : memref<8x512xf32, #tpu.memory_space<vmem>>, vector<8x256xf32>
    %c6 = arith.constant 6 : index
    %c0_53 = arith.constant 0 : index
    %c0_54 = arith.constant 0 : index
    %50 = vector.load %arg2[%c6, %c0_53, %c0_54] : memref<9x8x8xf32, #tpu.memory_space<vmem>>, vector<1x8x8xf32>
    %51 = vector.shape_cast %50 : vector<1x8x8xf32> to vector<8x8xf32>
    %cst_55 = arith.constant dense<0.000000e+00> : vector<8x256xf32>
    %52 = tpu.matmul %51, %49, %cst_55 {dimension_numbers = #tpu.dot_dimension_numbers<[1], [0], [0], [1], [0, 0, 1, 1], [], []>} : vector<8x8xf32>, vector<8x256xf32>, vector<8x256xf32> -> vector<8x256xf32>
    %53 = arith.addf %48, %52 : vector<8x256xf32>
    %c0_56 = arith.constant 0 : index
    %c144 = arith.constant 144 : index
    %54 = vector.load %arg10[%c0_56, %c144] : memref<8x512xf32, #tpu.memory_space<vmem>>, vector<8x256xf32>
    %c7 = arith.constant 7 : index
    %c0_57 = arith.constant 0 : index
    %c0_58 = arith.constant 0 : index
    %55 = vector.load %arg2[%c7, %c0_57, %c0_58] : memref<9x8x8xf32, #tpu.memory_space<vmem>>, vector<1x8x8xf32>
    %56 = vector.shape_cast %55 : vector<1x8x8xf32> to vector<8x8xf32>
    %cst_59 = arith.constant dense<0.000000e+00> : vector<8x256xf32>
    %57 = tpu.matmul %56, %54, %cst_59 {dimension_numbers = #tpu.dot_dimension_numbers<[1], [0], [0], [1], [0, 0, 1, 1], [], []>} : vector<8x8xf32>, vector<8x256xf32>, vector<8x256xf32> -> vector<8x256xf32>
    %58 = arith.addf %53, %57 : vector<8x256xf32>
    %c0_60 = arith.constant 0 : index
    %c145 = arith.constant 145 : index
    %59 = vector.load %arg12[%c0_60, %c145] : memref<8x512xf32, #tpu.memory_space<vmem>>, vector<8x256xf32>
    %c8 = arith.constant 8 : index
    %c0_61 = arith.constant 0 : index
    %c0_62 = arith.constant 0 : index
    %60 = vector.load %arg2[%c8, %c0_61, %c0_62] : memref<9x8x8xf32, #tpu.memory_space<vmem>>, vector<1x8x8xf32>
    %61 = vector.shape_cast %60 : vector<1x8x8xf32> to vector<8x8xf32>
    %cst_63 = arith.constant dense<0.000000e+00> : vector<8x256xf32>
    %62 = tpu.matmul %61, %59, %cst_63 {dimension_numbers = #tpu.dot_dimension_numbers<[1], [0], [0], [1], [0, 0, 1, 1], [], []>} : vector<8x8xf32>, vector<8x256xf32>, vector<8x256xf32> -> vector<8x256xf32>
    %63 = arith.addf %58, %62 : vector<8x256xf32>
    %cst_64 = arith.constant dense<0.000000e+00> : vector<8xf32>
    %64 = vector.multi_reduction <add>, %63, %cst_64 [1] : vector<8x256xf32> to vector<8xf32>
    %65 = vector.shape_cast %64 : vector<8xf32> to vector<8x1xf32>
    %66 = arith.mulf %63, %63 : vector<8x256xf32>
    %cst_65 = arith.constant dense<0.000000e+00> : vector<8xf32>
    %67 = vector.multi_reduction <add>, %66, %cst_65 [1] : vector<8x256xf32> to vector<8xf32>
    %68 = vector.shape_cast %67 : vector<8xf32> to vector<8x1xf32>
    %cst_66 = arith.constant 3.906250e-03 : f32
    %69 = vector.broadcast %cst_66 : f32 to vector<8x1xf32>
    %70 = arith.mulf %65, %69 : vector<8x1xf32>
    %cst_67 = arith.constant 3.906250e-03 : f32
    %71 = vector.broadcast %cst_67 : f32 to vector<8x1xf32>
    %72 = arith.mulf %68, %71 : vector<8x1xf32>
    %73 = arith.mulf %70, %70 : vector<8x1xf32>
    %74 = arith.subf %72, %73 : vector<8x1xf32>
    %cst_68 = arith.constant 0.000000e+00 : f32
    %75 = vector.broadcast %cst_68 : f32 to vector<8x1xf32>
    %76 = arith.maximumf %74, %75 : vector<8x1xf32>
    %cst_69 = arith.constant 9.99999974E-6 : f32
    %77 = vector.broadcast %cst_69 : f32 to vector<8x1xf32>
    %78 = arith.addf %76, %77 : vector<8x1xf32>
    %79 = math.rsqrt %78 : vector<8x1xf32>
    %80 = arith.mulf %11, %79 : vector<8x1xf32>
    %81 = arith.mulf %70, %80 : vector<8x1xf32>
    %82 = arith.subf %12, %81 : vector<8x1xf32>
    %83 = vector.broadcast %80 : vector<8x1xf32> to vector<8x256xf32>
    %84 = arith.mulf %63, %83 : vector<8x256xf32>
    %85 = vector.broadcast %82 : vector<8x1xf32> to vector<8x256xf32>
    %86 = arith.addf %84, %85 : vector<8x256xf32>
    %cst_70 = arith.constant 0.000000e+00 : f32
    %87 = vector.broadcast %cst_70 : f32 to vector<8x256xf32>
    %88 = arith.maximumf %86, %87 : vector<8x256xf32>
    %c0_71 = arith.constant 0 : index
    %c0_72 = arith.constant 0 : index
    %89 = vector.load %arg6[%c0_71, %c0_72] : memref<8x1xf32, #tpu.memory_space<vmem>>, vector<8x1xf32>
    %c0_73 = arith.constant 0 : index
    %c0_74 = arith.constant 0 : index
    %90 = vector.load %arg7[%c0_73, %c0_74] : memref<8x1xf32, #tpu.memory_space<vmem>>, vector<8x1xf32>
    %c0_75 = arith.constant 0 : index
    %c128_76 = arith.constant 128 : index
    %91 = vector.load %arg10[%c0_75, %c128_76] : memref<8x512xf32, #tpu.memory_space<vmem>>, vector<8x256xf32>
    tpu.vector_store %arg10[%c0_75, %c128_76], %88 {strides = array<i32>} : memref<8x512xf32, #tpu.memory_space<vmem>>, vector<8x256xf32>,
    %92 = vector.broadcast %7 : vector<1x256xf32> to vector<8x256xf32>
    %93 = arith.mulf %88, %92 : vector<8x256xf32>
    %c0_77 = arith.constant 0 : index
    %c128_78 = arith.constant 128 : index
    %94 = vector.load %arg11[%c0_77, %c128_78] : memref<8x512xf32, #tpu.memory_space<vmem>>, vector<8x256xf32>
    tpu.vector_store %arg11[%c0_77, %c128_78], %93 {strides = array<i32>} : memref<8x512xf32, #tpu.memory_space<vmem>>, vector<8x256xf32>,
    %95 = vector.broadcast %8 : vector<1x256xf32> to vector<8x256xf32>
    %96 = arith.mulf %88, %95 : vector<8x256xf32>
    %c0_79 = arith.constant 0 : index
    %c128_80 = arith.constant 128 : index
    %97 = vector.load %arg12[%c0_79, %c128_80] : memref<8x512xf32, #tpu.memory_space<vmem>>, vector<8x256xf32>
    tpu.vector_store %arg12[%c0_79, %c128_80], %96 {strides = array<i32>} : memref<8x512xf32, #tpu.memory_space<vmem>>, vector<8x256xf32>,
    %c0_81 = arith.constant 0 : index
    %c111_82 = arith.constant 111 : index
    %98 = vector.load %arg11[%c0_81, %c111_82] : memref<8x512xf32, #tpu.memory_space<vmem>>, vector<8x256xf32>
    %c0_83 = arith.constant 0 : index
    %c0_84 = arith.constant 0 : index
    %c0_85 = arith.constant 0 : index
    %99 = vector.load %arg5[%c0_83, %c0_84, %c0_85] : memref<9x8x8xf32, #tpu.memory_space<vmem>>, vector<1x8x8xf32>
    %100 = vector.shape_cast %99 : vector<1x8x8xf32> to vector<8x8xf32>
    %cst_86 = arith.constant dense<0.000000e+00> : vector<8x256xf32>
    %101 = tpu.matmul %100, %98, %cst_86 {dimension_numbers = #tpu.dot_dimension_numbers<[1], [0], [0], [1], [0, 0, 1, 1], [], []>} : vector<8x8xf32>, vector<8x256xf32>, vector<8x256xf32> -> vector<8x256xf32>
    %c0_87 = arith.constant 0 : index
    %c112_88 = arith.constant 112 : index
    %102 = vector.load %arg10[%c0_87, %c112_88] : memref<8x512xf32, #tpu.memory_space<vmem>>, vector<8x256xf32>
    %c1_89 = arith.constant 1 : index
    %c0_90 = arith.constant 0 : index
    %c0_91 = arith.constant 0 : index
    %103 = vector.load %arg5[%c1_89, %c0_90, %c0_91] : memref<9x8x8xf32, #tpu.memory_space<vmem>>, vector<1x8x8xf32>
    %104 = vector.shape_cast %103 : vector<1x8x8xf32> to vector<8x8xf32>
    %cst_92 = arith.constant dense<0.000000e+00> : vector<8x256xf32>
    %105 = tpu.matmul %104, %102, %cst_92 {dimension_numbers = #tpu.dot_dimension_numbers<[1], [0], [0], [1], [0, 0, 1, 1], [], []>} : vector<8x8xf32>, vector<8x256xf32>, vector<8x256xf32> -> vector<8x256xf32>
    %106 = arith.addf %101, %105 : vector<8x256xf32>
    %c0_93 = arith.constant 0 : index
    %c113_94 = arith.constant 113 : index
    %107 = vector.load %arg12[%c0_93, %c113_94] : memref<8x512xf32, #tpu.memory_space<vmem>>, vector<8x256xf32>
    %c2_95 = arith.constant 2 : index
    %c0_96 = arith.constant 0 : index
    %c0_97 = arith.constant 0 : index
    %108 = vector.load %arg5[%c2_95, %c0_96, %c0_97] : memref<9x8x8xf32, #tpu.memory_space<vmem>>, vector<1x8x8xf32>
    %109 = vector.shape_cast %108 : vector<1x8x8xf32> to vector<8x8xf32>
    %cst_98 = arith.constant dense<0.000000e+00> : vector<8x256xf32>
    %110 = tpu.matmul %109, %107, %cst_98 {dimension_numbers = #tpu.dot_dimension_numbers<[1], [0], [0], [1], [0, 0, 1, 1], [], []>} : vector<8x8xf32>, vector<8x256xf32>, vector<8x256xf32> -> vector<8x256xf32>
    %111 = arith.addf %106, %110 : vector<8x256xf32>
    %c0_99 = arith.constant 0 : index
    %c127_100 = arith.constant 127 : index
    %112 = vector.load %arg11[%c0_99, %c127_100] : memref<8x512xf32, #tpu.memory_space<vmem>>, vector<8x256xf32>
    %c3_101 = arith.constant 3 : index
    %c0_102 = arith.constant 0 : index
    %c0_103 = arith.constant 0 : index
    %113 = vector.load %arg5[%c3_101, %c0_102, %c0_103] : memref<9x8x8xf32, #tpu.memory_space<vmem>>, vector<1x8x8xf32>
    %114 = vector.shape_cast %113 : vector<1x8x8xf32> to vector<8x8xf32>
    %cst_104 = arith.constant dense<0.000000e+00> : vector<8x256xf32>
    %115 = tpu.matmul %114, %112, %cst_104 {dimension_numbers = #tpu.dot_dimension_numbers<[1], [0], [0], [1], [0, 0, 1, 1], [], []>} : vector<8x8xf32>, vector<8x256xf32>, vector<8x256xf32> -> vector<8x256xf32>
    %116 = arith.addf %111, %115 : vector<8x256xf32>
    %c0_105 = arith.constant 0 : index
    %c128_106 = arith.constant 128 : index
    %117 = vector.load %arg10[%c0_105, %c128_106] : memref<8x512xf32, #tpu.memory_space<vmem>>, vector<8x256xf32>
    %c4_107 = arith.constant 4 : index
    %c0_108 = arith.constant 0 : index
    %c0_109 = arith.constant 0 : index
    %118 = vector.load %arg5[%c4_107, %c0_108, %c0_109] : memref<9x8x8xf32, #tpu.memory_space<vmem>>, vector<1x8x8xf32>
    %119 = vector.shape_cast %118 : vector<1x8x8xf32> to vector<8x8xf32>
    %cst_110 = arith.constant dense<0.000000e+00> : vector<8x256xf32>
    %120 = tpu.matmul %119, %117, %cst_110 {dimension_numbers = #tpu.dot_dimension_numbers<[1], [0], [0], [1], [0, 0, 1, 1], [], []>} : vector<8x8xf32>, vector<8x256xf32>, vector<8x256xf32> -> vector<8x256xf32>
    %121 = arith.addf %116, %120 : vector<8x256xf32>
    %c0_111 = arith.constant 0 : index
    %c129_112 = arith.constant 129 : index
    %122 = vector.load %arg12[%c0_111, %c129_112] : memref<8x512xf32, #tpu.memory_space<vmem>>, vector<8x256xf32>
    %c5_113 = arith.constant 5 : index
    %c0_114 = arith.constant 0 : index
    %c0_115 = arith.constant 0 : index
    %123 = vector.load %arg5[%c5_113, %c0_114, %c0_115] : memref<9x8x8xf32, #tpu.memory_space<vmem>>, vector<1x8x8xf32>
    %124 = vector.shape_cast %123 : vector<1x8x8xf32> to vector<8x8xf32>
    %cst_116 = arith.constant dense<0.000000e+00> : vector<8x256xf32>
    %125 = tpu.matmul %124, %122, %cst_116 {dimension_numbers = #tpu.dot_dimension_numbers<[1], [0], [0], [1], [0, 0, 1, 1], [], []>} : vector<8x8xf32>, vector<8x256xf32>, vector<8x256xf32> -> vector<8x256xf32>
    %126 = arith.addf %121, %125 : vector<8x256xf32>
    %c0_117 = arith.constant 0 : index
    %c143_118 = arith.constant 143 : index
    %127 = vector.load %arg11[%c0_117, %c143_118] : memref<8x512xf32, #tpu.memory_space<vmem>>, vector<8x256xf32>
    %c6_119 = arith.constant 6 : index
    %c0_120 = arith.constant 0 : index
    %c0_121 = arith.constant 0 : index
    %128 = vector.load %arg5[%c6_119, %c0_120, %c0_121] : memref<9x8x8xf32, #tpu.memory_space<vmem>>, vector<1x8x8xf32>
    %129 = vector.shape_cast %128 : vector<1x8x8xf32> to vector<8x8xf32>
    %cst_122 = arith.constant dense<0.000000e+00> : vector<8x256xf32>
    %130 = tpu.matmul %129, %127, %cst_122 {dimension_numbers = #tpu.dot_dimension_numbers<[1], [0], [0], [1], [0, 0, 1, 1], [], []>} : vector<8x8xf32>, vector<8x256xf32>, vector<8x256xf32> -> vector<8x256xf32>
    %131 = arith.addf %126, %130 : vector<8x256xf32>
    %c0_123 = arith.constant 0 : index
    %c144_124 = arith.constant 144 : index
    %132 = vector.load %arg10[%c0_123, %c144_124] : memref<8x512xf32, #tpu.memory_space<vmem>>, vector<8x256xf32>
    %c7_125 = arith.constant 7 : index
    %c0_126 = arith.constant 0 : index
    %c0_127 = arith.constant 0 : index
    %133 = vector.load %arg5[%c7_125, %c0_126, %c0_127] : memref<9x8x8xf32, #tpu.memory_space<vmem>>, vector<1x8x8xf32>
    %134 = vector.shape_cast %133 : vector<1x8x8xf32> to vector<8x8xf32>
    %cst_128 = arith.constant dense<0.000000e+00> : vector<8x256xf32>
    %135 = tpu.matmul %134, %132, %cst_128 {dimension_numbers = #tpu.dot_dimension_numbers<[1], [0], [0], [1], [0, 0, 1, 1], [], []>} : vector<8x8xf32>, vector<8x256xf32>, vector<8x256xf32> -> vector<8x256xf32>
    %136 = arith.addf %131, %135 : vector<8x256xf32>
    %c0_129 = arith.constant 0 : index
    %c145_130 = arith.constant 145 : index
    %137 = vector.load %arg12[%c0_129, %c145_130] : memref<8x512xf32, #tpu.memory_space<vmem>>, vector<8x256xf32>
    %c8_131 = arith.constant 8 : index
    %c0_132 = arith.constant 0 : index
    %c0_133 = arith.constant 0 : index
    %138 = vector.load %arg5[%c8_131, %c0_132, %c0_133] : memref<9x8x8xf32, #tpu.memory_space<vmem>>, vector<1x8x8xf32>
    %139 = vector.shape_cast %138 : vector<1x8x8xf32> to vector<8x8xf32>
    %cst_134 = arith.constant dense<0.000000e+00> : vector<8x256xf32>
    %140 = tpu.matmul %139, %137, %cst_134 {dimension_numbers = #tpu.dot_dimension_numbers<[1], [0], [0], [1], [0, 0, 1, 1], [], []>} : vector<8x8xf32>, vector<8x256xf32>, vector<8x256xf32> -> vector<8x256xf32>
    %141 = arith.addf %136, %140 : vector<8x256xf32>
    %cst_135 = arith.constant dense<0.000000e+00> : vector<8xf32>
    %142 = vector.multi_reduction <add>, %141, %cst_135 [1] : vector<8x256xf32> to vector<8xf32>
    %143 = vector.shape_cast %142 : vector<8xf32> to vector<8x1xf32>
    %144 = arith.mulf %141, %141 : vector<8x256xf32>
    %cst_136 = arith.constant dense<0.000000e+00> : vector<8xf32>
    %145 = vector.multi_reduction <add>, %144, %cst_136 [1] : vector<8x256xf32> to vector<8xf32>
    %146 = vector.shape_cast %145 : vector<8xf32> to vector<8x1xf32>
    %cst_137 = arith.constant 3.906250e-03 : f32
    %147 = vector.broadcast %cst_137 : f32 to vector<8x1xf32>
    %148 = arith.mulf %143, %147 : vector<8x1xf32>
    %cst_138 = arith.constant 3.906250e-03 : f32
    %149 = vector.broadcast %cst_138 : f32 to vector<8x1xf32>
    %150 = arith.mulf %146, %149 : vector<8x1xf32>
    %151 = arith.mulf %148, %148 : vector<8x1xf32>
    %152 = arith.subf %150, %151 : vector<8x1xf32>
    %cst_139 = arith.constant 0.000000e+00 : f32
    %153 = vector.broadcast %cst_139 : f32 to vector<8x1xf32>
    %154 = arith.maximumf %152, %153 : vector<8x1xf32>
    %cst_140 = arith.constant 9.99999974E-6 : f32
    %155 = vector.broadcast %cst_140 : f32 to vector<8x1xf32>
    %156 = arith.addf %154, %155 : vector<8x1xf32>
    %157 = math.rsqrt %156 : vector<8x1xf32>
    %158 = arith.mulf %89, %157 : vector<8x1xf32>
    %159 = arith.mulf %148, %158 : vector<8x1xf32>
    %160 = arith.subf %90, %159 : vector<8x1xf32>
    %161 = vector.broadcast %158 : vector<8x1xf32> to vector<8x256xf32>
    %162 = arith.mulf %141, %161 : vector<8x256xf32>
    %163 = vector.broadcast %160 : vector<8x1xf32> to vector<8x256xf32>
    %164 = arith.addf %162, %163 : vector<8x256xf32>
    %cst_141 = arith.constant 0.000000e+00 : f32
    %165 = vector.broadcast %cst_141 : f32 to vector<8x256xf32>
    %166 = arith.maximumf %164, %165 : vector<8x256xf32>
    %c0_142 = arith.constant 0 : index
    %c0_143 = arith.constant 0 : index
    %c0_144 = arith.constant 0 : index
    %167 = vector.load %arg1[%c0_142, %c0_143, %c0_144] : memref<1x8x256xf32, #tpu.memory_space<vmem>>, vector<1x8x256xf32>
    %168 = vector.shape_cast %167 : vector<1x8x256xf32> to vector<8x256xf32>
    %169 = arith.addf %168, %166 : vector<8x256xf32>
    %c0_145 = arith.constant 0 : index
    %c0_146 = arith.constant 0 : index
    %c0_147 = arith.constant 0 : index
    %170 = vector.load %arg9[%c0_145, %c0_146, %c0_147] : memref<1x8x256xf32, #tpu.memory_space<vmem>>, vector<1x8x256xf32>
    %171 = vector.shape_cast %170 : vector<1x8x256xf32> to vector<8x256xf32>
    %172 = vector.shape_cast %169 : vector<8x256xf32> to vector<1x8x256xf32>
    tpu.vector_store %arg9[%c0_145, %c0_146, %c0_147], %172 {strides = array<i32>} : memref<1x8x256xf32, #tpu.memory_space<vmem>>, vector<1x8x256xf32>,
    return
  }
  func.func @transform_0(%arg0: i32) -> (i32, i32, i32) {
    %c0_i32 = arith.constant 0 : i32
    %c0_i32_0 = arith.constant 0 : i32
    %c0_i32_1 = arith.constant 0 : i32
    return %arg0, %c0_i32, %c0_i32_0 : i32, i32, i32
  }
  func.func @transform_1(%arg0: i32) -> (i32, i32, i32) {
    %c0_i32 = arith.constant 0 : i32
    %c0_i32_0 = arith.constant 0 : i32
    %c0_i32_1 = arith.constant 0 : i32
    %c0_i32_2 = arith.constant 0 : i32
    return %c0_i32, %c0_i32_0, %c0_i32_1 : i32, i32, i32
  }
  func.func @transform_2(%arg0: i32) -> (i32, i32) {
    %c0_i32 = arith.constant 0 : i32
    %c0_i32_0 = arith.constant 0 : i32
    %c0_i32_1 = arith.constant 0 : i32
    return %c0_i32, %c0_i32_0 : i32, i32
  }
  func.func @transform_3(%arg0: i32) -> (i32, i32) {
    %c0_i32 = arith.constant 0 : i32
    %c0_i32_0 = arith.constant 0 : i32
    %c0_i32_1 = arith.constant 0 : i32
    return %c0_i32, %c0_i32_0 : i32, i32
  }
  func.func @transform_4(%arg0: i32) -> (i32, i32, i32) {
    %c0_i32 = arith.constant 0 : i32
    %c0_i32_0 = arith.constant 0 : i32
    %c0_i32_1 = arith.constant 0 : i32
    %c0_i32_2 = arith.constant 0 : i32
    return %c0_i32, %c0_i32_0, %c0_i32_1 : i32, i32, i32
  }
  func.func @transform_5(%arg0: i32) -> (i32, i32) {
    %c0_i32 = arith.constant 0 : i32
    %c0_i32_0 = arith.constant 0 : i32
    %c0_i32_1 = arith.constant 0 : i32
    return %c0_i32, %c0_i32_0 : i32, i32
  }
  func.func @transform_6(%arg0: i32) -> (i32, i32) {
    %c0_i32 = arith.constant 0 : i32
    %c0_i32_0 = arith.constant 0 : i32
    %c0_i32_1 = arith.constant 0 : i32
    return %c0_i32, %c0_i32_0 : i32, i32
  }
  func.func @transform_7(%arg0: i32) -> (i32, i32) {
    %c0_i32 = arith.constant 0 : i32
    %c0_i32_0 = arith.constant 0 : i32
    %c0_i32_1 = arith.constant 0 : i32
    return %c0_i32, %c0_i32_0 : i32, i32
  }
  func.func @transform_8(%arg0: i32) -> (i32, i32, i32) {
    %c0_i32 = arith.constant 0 : i32
    %c0_i32_0 = arith.constant 0 : i32
    %c0_i32_1 = arith.constant 0 : i32
    return %arg0, %c0_i32, %c0_i32_0 : i32, i32, i32
  }
}

</mosaic_0001>

<bundles_post_ra>
// kernel: residual_block_in.1
= control target key start
LH: loop header
LB: loop body
LE: loop exit
PB: predicated region body
PF: predicated region fallthrough
CT: control target
= control target key end

     0   :  { %s2262_s27 = smov 0   ;;  %s2529_s0 = inlined_call_operand.vmem [shape: f32[2,8,256], index: 0, kind: input, shape index: {}]   ;;  %s2530_s1 = inlined_call_operand.vmem [shape: f32[9,8,8], index: 1, kind: input, shape index: {}]   ;;  %s2531_s2 = inlined_call_operand.vmem [shape: f32[8,1], index: 2, kind: input, shape index: {}]   ;;  %s2532_s3 = inlined_call_operand.vmem [shape: f32[8,1], index: 3, kind: input, shape index: {}]   ;;  %s2533_s4 = inlined_call_operand.vmem [shape: f32[9,8,8], index: 4, kind: input, shape index: {}]   ;;  %s2534_s5 = inlined_call_operand.vmem [shape: f32[8,1], index: 5, kind: input, shape index: {}]   ;;  %s2535_s6 = inlined_call_operand.vmem [shape: f32[8,1], index: 6, kind: input, shape index: {}]   ;;  %s2536_s7 = inlined_call_operand.vmem [shape: f32[2,256], index: 7, kind: input, shape index: {}]   ;;  %s2537_s8 = inlined_call_operand.vmem [shape: f32[2,8,256], index: 8, kind: output, shape index: {}]  }
   0x1 LB: > { %s2127_s28 = sadd.s32 4294967295, %s2205_s27   ;;  %p2131_p0 = scmp.ge.s32.totalorder %s2205_s27, 1  ;;  %s2205_s27 = sphi %s2262_s27, %s18_s27  }
   0x2   : > { %p262_p1 = scmp.lt.s32.totalorder %s2205_s27, 3 }
   0x4   : > { %p263_p2 = pnand %p2131_p0, %p262_p1 }
   0x5   : > { %p296_p3 = scmp.lt.s32.totalorder (!%p263_p2), %s2127_s28, 1  ;;  %s2208_s29 = smov (!%p263_p2), 16  }
   0x6   : > { %266 = sbr.rel (%p263_p2) target bundleno = 1323 (0x52b), region = 52  ;;  %s2209_s16 = smov (!%p263_p2), 17  }
   0x7   : > { %s2210_s17 = smov (!%p263_p2), 15   ;;  %s2211_s18 = smov (!%p263_p2), 1  }
   0x8   : > { %s2212_s19 = smov (!%p263_p2), 127   ;;  %s2213_s20 = smov (!%p263_p2), 113  }
   0x9   : > { %s2214_s21 = smov (!%p263_p2), 112   ;;  %s2215_s22 = smov (!%p263_p2), 111  }
   0xb   : > { %v322_v0 = vlaneseq  ;;  %v2207_v1 = vmov 0.0   ;;  %s2539_s28 = smov (!%p296_p3, %s2127_s28), 1  ;;  %v312_v3 = vld [vmem:[%s2536_s7] ss:$2 sm:$0x3]  ;;  %vm369_vm0 = vcmask 130048  }
   0xc   : > { %363 = vrot.lane.b32.xlu1 %v2207_v1, %s2208_s29  ;;  %442 = vmatprep.mubr.f32.mxu0 %v2207_v1  ;;  %v2136_v4 = vld [vmem:[%s2536_s7 + $0x1] ss:$2 sm:$0x3]  ;;  %s2173_s12 = sshll.u32 %s2539_s28, 4  ;;  %v2137_v23 = vld [vmem:[%s2530_s1 + $0x8] sm:$0xff]  ;;  %vm374_vm1 = vcmask 64512  }
   0xd   : > { %v323_v2 = vshrl.u32 %v322_v0, 7  ;;  %530 = vmatprep.mubr.f32.mxu1 %v2207_v1  ;;  %s300_s15 = scalar_lea.vmem %s2529_s0, %s2173_s12  ;;  %vm458_vm2 = vcmask 138240   ;;  %v354_v28 = vld [vmem:[%s2530_s1] sm:$0xff]  ;;  %vm551_vm3 = vcmask 121856   ;;  %v2140_v35 = vld [vmem:[%s2530_s1 + $0x10] sm:$0xff]  ;;  %vm640_vm4 = vcmask 7168  }
   0xe   : > { %v2290_v7 = vld [vmem:[%s300_s15] sm:$0xff]  ;;  %v2300_v11 = vld [vmem:[%s300_s15 + $0x8] sm:$0xff]  ;;  %v2142_v41 = vld [vmem:[%s2530_s1 + $0x18] sm:$0xff]  ;;  %vm813_vm5 = vcmask 1039360   ;;  %vm908_vm6 = vcmask 924672   ;;  %vm1003_vm7 = vcmask 916480  }
   0xf   : > { %v324_v5 = vsub.s32 0, %v323_v2  ;;  %v328_v6 = vsub.s32 1, %v323_v2  ;;  %365 = vrot.lane.b32.xlu0 %v2290_v7, %s2208_s29  ;;  %v2144_v39 = vld [vmem:[%s2530_s1 + $0x20] sm:$0xff]  ;;  %v2146_v48 = vld [vmem:[%s2530_s1 + $0x28] sm:$0xff]  ;;  %v2148_v53 = vld [vmem:[%s2530_s1 + $0x30] sm:$0xff]  ;;  %vm1092_vm8 = vcmask 908288  }
  0x10   : > { %452 = vrot.lane.b32.xlu1 %v2207_v1, %s2209_s16  ;;  %v2150_v59 = vld [vmem:[%s2530_s1 + $0x38] sm:$0xff]  ;;  %v2152_v0 = vld [vmem:[%s2530_s1 + $0x40] sm:$0xff] }
  0x11   : > { %v2292_v8 = vrot.slane %v312_v3, %v324_v5  ;;  %v2294_v9 = vrot.slane %v2136_v4, %v328_v6  ;;  %v2298_v10 = vrot.slane %v312_v3, %v328_v6  ;;  %v2311_v15 = vrot.slane %v2136_v4, %v324_v5 }
  0x13   : > { %v332_v12 = vmul.f32 %v2292_v8, %v2290_v7  ;;  %v348_v13 = vmul.f32 %v2294_v9, %v2300_v11  ;;  %367 = vrot.lane.b32.xlu0 %v2300_v11, %s2208_s29  ;;  %v333_v14 = vmul.f32 %v2298_v10, %v2300_v11  ;;  %v347_v16 = vmul.f32 %v2311_v15, %v2290_v7 }
  0x15   : > { %454 = vrot.lane.b32.xlu1 %v332_v12, %s2209_s16 }
  0x17   : > { %456 = vrot.lane.b32.xlu0 %v333_v14, %s2209_s16 }
  0x19   : > { %549 = vrot.lane.b32.xlu1 %v348_v13, %s2210_s17 }
  0x1b   : > { %547 = vrot.lane.b32.xlu0 %v347_v16, %s2210_s17 }
  0x1d   : > { %636 = vrot.lane.b32.xlu1 %v332_v12, %s2211_s18 }
  0x1f   : > { %545 = vrot.lane.b32.xlu0 %v2207_v1, %s2210_s17 }
  0x21   : > { %634 = vrot.lane.b32.xlu1 %v2207_v1, %s2211_s18 }
  0x23   : > { %638 = vrot.lane.b32.xlu0 %v333_v14, %s2211_s18 }
  0x25   : > { %811 = vrot.lane.b32.xlu1 %v2207_v1, %s2212_s19 }
  0x27   : > { %809 = vrot.lane.b32.xlu0 %v348_v13, %s2212_s19 }
  0x29   : > { %904 = vrot.lane.b32.xlu1 %v333_v14, %s2213_s20 }
  0x2b   : > { %807 = vrot.lane.b32.xlu0 %v347_v16, %s2212_s19 }
  0x2d   : > { %902 = vrot.lane.b32.xlu1 %v332_v12, %s2213_s20 }
  0x2f   : > { %906 = vrot.lane.b32.xlu0 %v2207_v1, %s2213_s20 }
  0x31   : > { %1001 = vrot.lane.b32.xlu1 %v2207_v1, %s2214_s21 }
  0x33   : > { %999 = vrot.lane.b32.xlu0 %v2300_v11, %s2214_s21 }
  0x35   : > { %1088 = vrot.lane.b32.xlu1 %v348_v13, %s2215_s22 }
  0x37   : > { %997 = vrot.lane.b32.xlu0 %v2290_v7, %s2214_s21 }
  0x39   : > { %1086 = vrot.lane.b32.xlu1 %v347_v16, %s2215_s22 }
  0x3b   : > { %1090 = vrot.lane.b32.xlu0 %v2207_v1, %s2215_s22 }
  0x7e   : > { %v364_v17 = vpop.permute.xlu1 %363 }
  0x81   : > { %v366_v19 = vpop.permute.xlu0 %365 }
  0x82   : > { %v453_v18 = vpop.permute.xlu1 %452  ;;  %v370_v24 = vsel %vm369_vm0, %v364_v17, %v366_v19 }
  0x85   : > { %v368_v21 = vpop.permute.xlu0 %367 }
  0x86   : > { %v371_v22 = vsel %vm369_vm0, %v366_v19, %v368_v21 }
  0x87   : > { %v455_v20 = vpop.permute.xlu1 %454  ;;  %408 = vmatprep.subr.mxu0 %v371_v22 }
  0x88   : > { %409 = vmatpush1.msra.mxu0 %v370_v24  ;;  %v459_v29 = vsel %vm458_vm2, %v453_v18, %v455_v20 }
  0x89   : > { %v457_v26 = vpop.permute.xlu0 %456  ;;  %2138 = vmatmul.mubr.msk.f32.vlgmr.msra.gmra.mxu0 %vm374_vm1, %v2137_v23 }
  0x8a   : > { %v460_v27 = vsel %vm458_vm2, %v455_v20, %v457_v26  ;;  %623 = vmatprep.mubr.f32.mxu0 %v2207_v1 }
  0x8b   : > { %v550_v25 = vpop.permute.xlu1 %549  ;;  %496 = vmatprep.subr.mxu1 %v460_v27 }
  0x8c   : > { %497 = vmatpush1.msra.mxu1 %v459_v29 }
  0x8d   : > { %v548_v31 = vpop.permute.xlu0 %547  ;;  %2139 = vmatmul.mubr.msk.f32.vlgmr.msra.gmra.mxu1 %vm374_vm1, %v354_v28 }
  0x8e   : > { %v553_v32 = vsel %vm551_vm3, %v548_v31, %v550_v25  ;;  %712 = vmatprep.mubr.f32.mxu1 %v2207_v1 }
  0x8f   : > { %v637_v30 = vpop.permute.xlu1 %636  ;;  %589 = vmatprep.subr.mxu0 %v553_v32 }
  0x91   : > { %v546_v34 = vpop.permute.xlu0 %545 }
  0x92   : > { %v552_v36 = vsel %vm551_vm3, %v546_v34, %v548_v31 }
  0x93   : > { %v635_v33 = vpop.permute.xlu1 %634  ;;  %590 = vmatpush1.msra.mxu0 %v552_v36 }
  0x94   : > { %2141 = vmatmul.mubr.msk.f32.vlgmr.msra.gmra.mxu0 %vm374_vm1, %v2140_v35  ;;  %756 = vmatprep.subr.mxu0 %v2300_v11  ;;  %v641_v42 = vsel %vm640_vm4, %v635_v33, %v637_v30 }
  0x95   : > { %v639_v38 = vpop.permute.xlu0 %638  ;;  %757 = vmatpush1.msra.mxu0 %v2290_v7  ;;  %790 = vmatprep.mubr.f32.mxu0 %v2207_v1 }
  0x96   : > { %v642_v40 = vsel %vm640_vm4, %v637_v30, %v639_v38 }
  0x97   : > { %v812_v37 = vpop.permute.xlu1 %811  ;;  %678 = vmatprep.subr.mxu1 %v642_v40 }
  0x98   : > { %679 = vmatpush1.msra.mxu1 %v641_v42  ;;  %2145 = vmatmul.mubr.msk.f32.vlgmr.msra.gmra.mxu0 %vm374_vm1, %v2144_v39 }
  0x99   : > { %v810_v44 = vpop.permute.xlu0 %809  ;;  %2143 = vmatmul.mubr.msk.f32.vlgmr.msra.gmra.mxu1 %vm374_vm1, %v2142_v41  ;;  %980 = vmatprep.mubr.f32.mxu0 %v2207_v1 }
  0x9a   : > { %v815_v45 = vsel %vm813_vm5, %v810_v44, %v812_v37  ;;  %885 = vmatprep.mubr.f32.mxu1 %v2207_v1 }
  0x9b   : > { %v905_v43 = vpop.permute.xlu1 %904  ;;  %851 = vmatprep.subr.mxu1 %v815_v45 }
  0x9d   : > { %v808_v47 = vpop.permute.xlu0 %807 }
  0x9e   : > { %v814_v49 = vsel %vm813_vm5, %v808_v47, %v810_v44  ;;  %v2216_v47 = vmov 0  }
  0x9f   : > { %v903_v46 = vpop.permute.xlu1 %902  ;;  %852 = vmatpush1.msra.mxu1 %v814_v49  ;;  %2193 = vset.pattern.permute.xlu0 %v2216_v47 }
  0xa0   : > { %2147 = vmatmul.mubr.msk.f32.vlgmr.msra.gmra.mxu1 %vm374_vm1, %v2146_v48  ;;  %v909_v54 = vsel %vm908_vm6, %v903_v46, %v905_v43  ;;  %2194 = vset.pattern.permute.xlu1 %v2216_v47 }
  0xa1   : > { %v907_v51 = vpop.permute.xlu0 %906  ;;  %1075 = vmatprep.mubr.f32.mxu1 %v2207_v1 }
  0xa2   : > { %v910_v52 = vsel %vm908_vm6, %v905_v43, %v907_v51 }
  0xa3   : > { %v1002_v50 = vpop.permute.xlu1 %1001  ;;  %946 = vmatprep.subr.mxu0 %v910_v52 }
  0xa4   : > { %947 = vmatpush1.msra.mxu0 %v909_v54 }
  0xa5   : > { %v1000_v55 = vpop.permute.xlu0 %999  ;;  %2149 = vmatmul.mubr.msk.f32.vlgmr.msra.gmra.mxu0 %vm374_vm1, %v2148_v53 }
  0xa6   : > { %v1005_v57 = vsel %vm1003_vm7, %v1000_v55, %v1002_v50  ;;  %1164 = vmatprep.mubr.f32.mxu0 %v2207_v1 }
  0xa7   : > { %v1089_v56 = vpop.permute.xlu1 %1088  ;;  %1041 = vmatprep.subr.mxu1 %v1005_v57 }
  0xa9   : > { %v998_v58 = vpop.permute.xlu0 %997 }
  0xaa   : > { %v1004_v60 = vsel %vm1003_vm7, %v998_v58, %v1000_v55 }
  0xab   : > { %1042 = vmatpush1.msra.mxu1 %v1004_v60  ;;  %v1087_v61 = vpop.permute.xlu1 %1086 }
  0xac   : > { %2151 = vmatmul.mubr.msk.f32.vlgmr.msra.gmra.mxu1 %vm374_vm1, %v2150_v59  ;;  %v1093_v2 = vsel %vm1092_vm8, %v1087_v61, %v1089_v56  ;;  %v318_v59 = vld [vmem:[%s2532_s3] sm:$0xff] }
  0xad   : > { %v1091_v62 = vpop.permute.xlu0 %1090  ;;  %1308 = vmatprep.mubr.f32.mxu1 %v2207_v1 }
  0xae   : > { %v1094_v63 = vsel %vm1092_vm8, %v1089_v56, %v1091_v62  ;;  %v317_v56 = vld [vmem:[%s2531_s2] sm:$0xff] }
  0xaf   : > { %1130 = vmatprep.subr.mxu0 %v1094_v63 }
  0xb0   : > { %1131 = vmatpush1.msra.mxu0 %v1093_v2 }
  0xb1   : > { %2153 = vmatmul.mubr.msk.f32.vlgmr.msra.gmra.mxu0 %vm374_vm1, %v2152_v0 }
  0xb2   : > { %1395 = vmatprep.mubr.f32.mxu0 %v2207_v1 }
 0x149   : > { %v444_v3 = vpop.f32.mrf.mxu0 }
 0x14b   : > { %v446_v4 = vpop.f32.mrf.mxu0 }
 0x14d   : > { %v532_v5 = vpop.f32.mrf.mxu1 }
 0x14e   : > { %v533_v13 = vadd.f32 %v532_v5, %v444_v3 }
 0x14f   : > { %v534_v6 = vpop.f32.mrf.mxu1 }
 0x150   : > { %v535_v14 = vadd.f32 %v534_v6, %v446_v4 }
 0x154   : > { %v625_v12 = vpop.f32.mrf.mxu0 }
 0x155   : > { %v630_v18 = vadd.f32 %v625_v12, %v533_v13 }
 0x156   : > { %v627_v16 = vpop.f32.mrf.mxu0 }
 0x157   : > { %v631_v19 = vadd.f32 %v627_v16, %v535_v14 }
 0x158   : > { %v792_v21 = vpop.f32.mrf.mxu0 }
 0x159   : > { %v714_v17 = vpop.f32.mrf.mxu1 }
 0x15a   : > { %v719_v22 = vadd.f32 %v714_v17, %v630_v18  ;;  %v794_v24 = vpop.f32.mrf.mxu0 }
 0x15b   : > { %v716_v20 = vpop.f32.mrf.mxu1 }
 0x15c   : > { %v720_v23 = vadd.f32 %v716_v20, %v631_v19  ;;  %v797_v26 = vadd.f32 %v792_v21, %v719_v22 }
 0x15e   : > { %v798_v27 = vadd.f32 %v794_v24, %v720_v23 }
 0x160   : > { %v887_v25 = vpop.f32.mrf.mxu1 }
 0x161   : > { %v892_v30 = vadd.f32 %v887_v25, %v797_v26  ;;  %v2154_v25 = vld [vmem:[%s2533_s4 + $0x8] sm:$0xff] }
 0x162   : > { %v889_v28 = vpop.f32.mrf.mxu1 }
 0x163   : > { %v893_v31 = vadd.f32 %v889_v28, %v798_v27 }
 0x165   : > { %v982_v29 = vpop.f32.mrf.mxu0 }
 0x166   : > { %v987_v33 = vadd.f32 %v982_v29, %v892_v30 }
 0x167   : > { %v984_v32 = vpop.f32.mrf.mxu0 }
 0x168   : > { %v988_v35 = vadd.f32 %v984_v32, %v893_v31  ;;  %v1222_v32 = vld [vmem:[%s2533_s4] sm:$0xff] }
 0x16c   : > { %v1077_v34 = vpop.f32.mrf.mxu1 }
 0x16d   : > { %v1082_v37 = vadd.f32 %v1077_v34, %v987_v33 }
 0x16e   : > { %v1079_v36 = vpop.f32.mrf.mxu1 }
 0x16f   : > { %v1083_v39 = vadd.f32 %v1079_v36, %v988_v35  ;;  %v2157_v36 = vld [vmem:[%s2533_s4 + $0x10] sm:$0xff] }
 0x171   : > { %v1166_v38 = vpop.f32.mrf.mxu0 }
 0x172   : > { %v1171_v40 = vadd.f32 %v1166_v38, %v1082_v37 }
 0x173   : > { %v1168_v41 = vpop.f32.mrf.mxu0 }
 0x174   : > { %v1172_v42 = vadd.f32 %v1168_v41, %v1083_v39  ;;  %v1176_v44 = vmul.f32 %v1171_v40, %v1171_v40 }
 0x176   : > { %v1173_v43 = vadd.f32 %v1172_v42, %v1171_v40  ;;  %v1177_v45 = vmul.f32 %v1172_v42, %v1172_v42 }
 0x178   : > { %1174 = vadd.xlane.f32.xlu0 %v1173_v43  ;;  %v1178_v46 = vadd.f32 %v1177_v45, %v1176_v44 }
 0x17a   : > { %1179 = vadd.xlane.f32.xlu1 %v1178_v46  ;;  %v2161_v46 = vld [vmem:[%s2533_s4 + $0x20] sm:$0xff] }
 0x201   : > { %v1175_v48 = vpop.xlane.xlu0 %1174 }
 0x202   : > { %v1181_v49 = vmul.f32 0.00390625, %v1175_v48 }
 0x203   : > { %v1180_v50 = vpop.xlane.xlu1 %1179 }
 0x204   : > { %v1183_v51 = vmul.f32 %v1181_v49, %v1181_v49  ;;  %v1182_v52 = vmul.f32 0.00390625, %v1180_v50  ;;  %v2163_v50 = vld [vmem:[%s2533_s4 + $0x28] sm:$0xff] }
 0x206   : > { %v1184_v53 = vsub.f32 %v1182_v52, %v1183_v51 }
 0x208   : > { %v1185_v54 = vmax.f32 %v1184_v53, 0.0  ;;  %v2165_v53 = vld [vmem:[%s2533_s4 + $0x30] sm:$0xff] }
 0x20a   : > { %v1186_v55 = vadd.f32 1e-05, %v1185_v54 }
 0x20c   : > { %2195 = vrsqrt.f32 %v1186_v55  ;;  %v2167_v55 = vld [vmem:[%s2533_s4 + $0x38] sm:$0xff] }
 0x219   : > { %v2196_v57 = vpop.eup %2195 }
 0x21a   : > { %v1188_v58 = vmul.f32 %v2196_v57, %v317_v56 }
 0x21c   : > { %1193 = vperm.xlu0 %2193, %v1188_v58   ;;  %v1189_v60 = vmul.f32 %v1188_v58, %v1181_v49 }
 0x21e   : > { %v1190_v61 = vsub.f32 %v318_v59, %v1189_v60  ;;  %v2169_v60 = vld [vmem:[%s2533_s4 + $0x40] sm:$0xff] }
 0x220   : > { %1200 = vperm.xlu1 %2194, %v1190_v61   ;;  %1410 = vrot.lane.b32.xlu0 %v2207_v1, %s2210_s17 }
 0x224   : > { %1231 = vrot.lane.b32.xlu1 %v2207_v1, %s2208_s29  ;;  %1768 = vrot.lane.b32.xlu0 %v2207_v1, %s2213_s20 }
 0x228   : > { %1318 = vrot.lane.b32.xlu1 %v2207_v1, %s2209_s16 }
 0x22c   : > { %1498 = vrot.lane.b32.xlu1 %v2207_v1, %s2211_s18 }
 0x230   : > { %1674 = vrot.lane.b32.xlu1 %v2207_v1, %s2212_s19 }
 0x234   : > { %1862 = vrot.lane.b32.xlu1 %v2207_v1, %s2214_s21 }
 0x297   : > { %v1194_v62 = vpop.permute.xlu0 %1193 }
 0x298   : > { %v1196_v63 = vmul.f32 %v1194_v62, %v1171_v40  ;;  %v1197_v0 = vmul.f32 %v1194_v62, %v1172_v42  ;;  %v2159_v42 = vld [vmem:[%s2533_s4 + $0x18] sm:$0xff] }
 0x29b   : > { %v1201_v2 = vpop.permute.xlu1 %1200 }
 0x29c   : > { %v1203_v3 = vadd.f32 %v1201_v2, %v1196_v63  ;;  %v1204_v4 = vadd.f32 %v1201_v2, %v1197_v0 }
 0x29e   : > { %v2425_v5 = vmax.f32 %v1203_v3, 0.0  ;;  %v1206_v6 = vmax.f32 %v1204_v4, 0.0 }
 0x2a0   : > { %1860 = vrot.lane.b32.xlu0 %v1206_v6, %s2214_s21  ;;  %1233 = vrot.lane.b32.xlu1 %v2425_v5, %s2208_s29  ;;  %v1215_v12 = vmul.f32 %v2425_v5, %v2311_v15  ;;  %v1212_v13 = vmul.f32 %v1206_v6, %v2298_v10  ;;  %v1211_v14 = vmul.f32 %v2425_v5, %v2292_v8  ;;  %v1232_v8 = vpop.permute.xlu1 %1231  ;;  %v1411_v15 = vpop.permute.xlu0 %1410 }
 0x2a1   : > { %v1216_v16 = vmul.f32 %v1206_v6, %v2294_v9 }
 0x2a4   : > { %1235 = vrot.lane.b32.xlu1 %v1206_v6, %s2208_s29  ;;  %1412 = vrot.lane.b32.xlu0 %v1215_v12, %s2210_s17  ;;  %v1319_v9 = vpop.permute.xlu1 %1318  ;;  %v1769_v18 = vpop.permute.xlu0 %1768 }
 0x2a8   : > { %1502 = vrot.lane.b32.xlu0 %v1212_v13, %s2211_s18  ;;  %1320 = vrot.lane.b32.xlu1 %v1211_v14, %s2209_s16  ;;  %v1499_v10 = vpop.permute.xlu1 %1498 }
 0x2ac   : > { %1672 = vrot.lane.b32.xlu0 %v1216_v16, %s2212_s19  ;;  %1322 = vrot.lane.b32.xlu1 %v1212_v13, %s2209_s16  ;;  %v1675_v17 = vpop.permute.xlu1 %1674 }
 0x2b0   : > { %1670 = vrot.lane.b32.xlu0 %v1215_v12, %s2212_s19  ;;  %1414 = vrot.lane.b32.xlu1 %v1216_v16, %s2210_s17  ;;  %v1863_v19 = vpop.permute.xlu1 %1862 }
 0x2b4   : > { %1858 = vrot.lane.b32.xlu0 %v2425_v5, %s2214_s21  ;;  %1500 = vrot.lane.b32.xlu1 %v1211_v14, %s2211_s18 }
 0x2b8   : > { %1766 = vrot.lane.b32.xlu1 %v1212_v13, %s2213_s20  ;;  %1950 = vrot.lane.b32.xlu0 %v2207_v1, %s2215_s22 }
 0x2bc   : > { %1764 = vrot.lane.b32.xlu1 %v1211_v14, %s2213_s20  ;;  %s305_s20 = scalar_lea.vmem %s2537_s8, %s2173_s12 }
 0x2c0   : > { %1948 = vrot.lane.b32.xlu1 %v1216_v16, %s2215_s22 }
 0x2c4   : > { %1946 = vrot.lane.b32.xlu1 %v1215_v12, %s2215_s22 }
 0x312   : > { %v1861_v20 = vpop.permute.xlu0 %1860  ;;  %v1234_v21 = vpop.permute.xlu1 %1233 }
 0x313   : > { %v1237_v26 = vsel %vm369_vm0, %v1232_v8, %v1234_v21  ;;  %v1865_v49 = vsel %vm1003_vm7, %v1861_v20, %v1863_v19 }
 0x316   : > { %v1413_v22 = vpop.permute.xlu0 %1412  ;;  %v1236_v23 = vpop.permute.xlu1 %1235 }
 0x317   : > { %v1238_v24 = vsel %vm369_vm0, %v1234_v21, %v1236_v23  ;;  %v1416_v37 = vsel %vm551_vm3, %v1411_v15, %v1413_v22 }
 0x318   : > { %1274 = vmatprep.subr.mxu1 %v1238_v24 }
 0x319   : > { %1275 = vmatpush1.msra.mxu1 %v1237_v26 }
 0x31a   : > { %v1503_v27 = vpop.permute.xlu0 %1502  ;;  %v1321_v28 = vpop.permute.xlu1 %1320  ;;  %2155 = vmatmul.mubr.msk.f32.vlgmr.msra.gmra.mxu1 %vm374_vm1, %v2154_v25 }
 0x31b   : > { %1487 = vmatprep.mubr.f32.mxu1 %v2207_v1  ;;  %v1324_v33 = vsel %vm458_vm2, %v1319_v9, %v1321_v28 }
 0x31e   : > { %v1323_v29 = vpop.permute.xlu1 %1322  ;;  %v1673_v30 = vpop.permute.xlu0 %1672 }
 0x31f   : > { %v1325_v31 = vsel %vm458_vm2, %v1321_v28, %v1323_v29  ;;  %v1677_v43 = vsel %vm813_vm5, %v1673_v30, %v1675_v17 }
 0x320   : > { %1361 = vmatprep.subr.mxu0 %v1325_v31 }
 0x321   : > { %1362 = vmatpush1.msra.mxu0 %v1324_v33 }
 0x322   : > { %v1415_v34 = vpop.permute.xlu1 %1414  ;;  %2156 = vmatmul.mubr.msk.f32.vlgmr.msra.gmra.mxu0 %vm374_vm1, %v1222_v32  ;;  %v1671_v38 = vpop.permute.xlu0 %1670 }
 0x323   : > { %v1417_v35 = vsel %vm551_vm3, %v1413_v22, %v1415_v34  ;;  %1575 = vmatprep.mubr.f32.mxu0 %v2207_v1  ;;  %v1676_v44 = vsel %vm813_vm5, %v1671_v38, %v1673_v30 }
 0x324   : > { %1453 = vmatprep.subr.mxu1 %v1417_v35 }
 0x325   : > { %1454 = vmatpush1.msra.mxu1 %v1416_v37 }
 0x326   : > { %1619 = vmatprep.subr.mxu1 %v1206_v6  ;;  %v1501_v39 = vpop.permute.xlu1 %1500  ;;  %2158 = vmatmul.mubr.msk.f32.vlgmr.msra.gmra.mxu1 %vm374_vm1, %v2157_v36  ;;  %v1859_v47 = vpop.permute.xlu0 %1858 }
 0x327   : > { %v1504_v40 = vsel %vm640_vm4, %v1499_v10, %v1501_v39  ;;  %1620 = vmatpush1.msra.mxu1 %v2425_v5  ;;  %v1505_v41 = vsel %vm640_vm4, %v1501_v39, %v1503_v27  ;;  %1653 = vmatprep.mubr.f32.mxu1 %v2207_v1  ;;  %v1864_v51 = vsel %vm1003_vm7, %v1859_v47, %v1861_v20 }
 0x328   : > { %1541 = vmatprep.subr.mxu0 %v1505_v41 }
 0x329   : > { %1542 = vmatpush1.msra.mxu0 %v1504_v40 }
 0x32a   : > { %2160 = vmatmul.mubr.msk.f32.vlgmr.msra.gmra.mxu0 %vm374_vm1, %v2159_v42  ;;  %1713 = vmatprep.subr.mxu0 %v1677_v43  ;;  %v1767_v45 = vpop.permute.xlu1 %1766  ;;  %v1951_v56 = vpop.permute.xlu0 %1950 }
 0x32b   : > { %1714 = vmatpush1.msra.mxu0 %v1676_v44  ;;  %v1771_v48 = vsel %vm908_vm6, %v1767_v45, %v1769_v18  ;;  %1747 = vmatprep.mubr.f32.mxu0 %v2207_v1 }
 0x32c   : > { %1807 = vmatprep.subr.mxu1 %v1771_v48  ;;  %1901 = vmatprep.subr.mxu0 %v1865_v49  ;;  %v1208_v49 = vld [vmem:[%s2535_s6] sm:$0xff] }
 0x32d   : > { %2162 = vmatmul.mubr.msk.f32.vlgmr.msra.gmra.mxu1 %vm374_vm1, %v2161_v46  ;;  %v1207_v46 = vld [vmem:[%s2534_s5] sm:$0xff] }
 0x32e   : > { %2164 = vmatmul.mubr.msk.f32.vlgmr.msra.gmra.mxu0 %vm374_vm1, %v2163_v50  ;;  %v1765_v52 = vpop.permute.xlu1 %1764  ;;  %1841 = vmatprep.mubr.f32.mxu1 %v2207_v1 }
 0x32f   : > { %1902 = vmatpush1.msra.mxu0 %v1864_v51  ;;  %v1770_v54 = vsel %vm908_vm6, %v1765_v52, %v1767_v45  ;;  %1935 = vmatprep.mubr.f32.mxu0 %v2207_v1 }
 0x330   : > { %1808 = vmatpush1.msra.mxu1 %v1770_v54 }
 0x331   : > { %2166 = vmatmul.mubr.msk.f32.vlgmr.msra.gmra.mxu1 %vm374_vm1, %v2165_v53 }
 0x332   : > { %v1949_v57 = vpop.permute.xlu1 %1948  ;;  %2168 = vmatmul.mubr.msk.f32.vlgmr.msra.gmra.mxu0 %vm374_vm1, %v2167_v55  ;;  %2023 = vmatprep.mubr.f32.mxu1 %v2207_v1 }
 0x333   : > { %v1953_v58 = vsel %vm1092_vm8, %v1949_v57, %v1951_v56 }
 0x334   : > { %1989 = vmatprep.subr.mxu1 %v1953_v58 }
 0x336   : > { %v1947_v59 = vpop.permute.xlu1 %1946 }
 0x337   : > { %v1952_v61 = vsel %vm1092_vm8, %v1947_v59, %v1949_v57 }
 0x338   : > { %1990 = vmatpush1.msra.mxu1 %v1952_v61 }
 0x339   : > { %2170 = vmatmul.mubr.msk.f32.vlgmr.msra.gmra.mxu1 %vm374_vm1, %v2169_v60 }
 0x3da   : > { %v1310_v62 = vpop.f32.mrf.mxu1 }
 0x3dc   : > { %v1312_v63 = vpop.f32.mrf.mxu1 }
 0x3e2   : > { %v1397_v0 = vpop.f32.mrf.mxu0 }
 0x3e3   : > { %v1398_v2 = vadd.f32 %v1397_v0, %v1310_v62 }
 0x3e4   : > { %v1399_v3 = vpop.f32.mrf.mxu0 }
 0x3e5   : > { %v1400_v4 = vadd.f32 %v1399_v3, %v1312_v63 }
 0x3e6   : > { %v1489_v1 = vpop.f32.mrf.mxu1 }
 0x3e7   : > { %v1494_v5 = vadd.f32 %v1489_v1, %v1398_v2 }
 0x3e8   : > { %v1491_v6 = vpop.f32.mrf.mxu1 }
 0x3e9   : > { %v1495_v12 = vadd.f32 %v1491_v6, %v1400_v4 }
 0x3ea   : > { %v1577_v13 = vpop.f32.mrf.mxu0 }
 0x3eb   : > { %v1582_v14 = vadd.f32 %v1577_v13, %v1494_v5 }
 0x3ec   : > { %v1579_v16 = vpop.f32.mrf.mxu0 }
 0x3ed   : > { %v1583_v8 = vadd.f32 %v1579_v16, %v1495_v12  ;;  %v1655_v9 = vpop.f32.mrf.mxu1 }
 0x3ee   : > { %v1660_v10 = vadd.f32 %v1655_v9, %v1582_v14  ;;  %v1749_v15 = vpop.f32.mrf.mxu0 }
 0x3ef   : > { %v1657_v17 = vpop.f32.mrf.mxu1 }
 0x3f0   : > { %v1661_v18 = vadd.f32 %v1657_v17, %v1583_v8  ;;  %v1754_v19 = vadd.f32 %v1749_v15, %v1660_v10  ;;  %v1751_v20 = vpop.f32.mrf.mxu0 }
 0x3f1   : > { %v1843_v21 = vpop.f32.mrf.mxu1 }
 0x3f2   : > { %v1755_v22 = vadd.f32 %v1751_v20, %v1661_v18  ;;  %v1937_v24 = vpop.f32.mrf.mxu0  ;;  %v1848_v25 = vadd.f32 %v1843_v21, %v1754_v19 }
 0x3f3   : > { %v1845_v23 = vpop.f32.mrf.mxu1 }
 0x3f4   : > { %v1849_v26 = vadd.f32 %v1845_v23, %v1755_v22  ;;  %v1939_v27 = vpop.f32.mrf.mxu0  ;;  %v1942_v28 = vadd.f32 %v1937_v24, %v1848_v25 }
 0x3f6   : > { %v1943_v30 = vadd.f32 %v1939_v27, %v1849_v26 }
 0x3f9   : > { %v2025_v29 = vpop.f32.mrf.mxu1 }
 0x3fa   : > { %v2030_v31 = vadd.f32 %v2025_v29, %v1942_v28 }
 0x3fb   : > { %v2027_v32 = vpop.f32.mrf.mxu1 }
 0x3fc   : > { %v2031_v33 = vadd.f32 %v2027_v32, %v1943_v30  ;;  %v2035_v35 = vmul.f32 %v2030_v31, %v2030_v31 }
 0x3fe   : > { %v2032_v34 = vadd.f32 %v2031_v33, %v2030_v31  ;;  %v2036_v36 = vmul.f32 %v2031_v33, %v2031_v33 }
 0x400   : > { %2033 = vadd.xlane.f32.xlu0 %v2032_v34  ;;  %v2037_v37 = vadd.f32 %v2036_v36, %v2035_v35 }
 0x402   : > { %2038 = vadd.xlane.f32.xlu1 %v2037_v37 }
 0x489   : > { %v2034_v38 = vpop.xlane.xlu0 %2033 }
 0x48a   : > { %v2040_v39 = vmul.f32 0.00390625, %v2034_v38 }
 0x48b   : > { %v2039_v40 = vpop.xlane.xlu1 %2038 }
 0x48c   : > { %v2042_v41 = vmul.f32 %v2040_v39, %v2040_v39  ;;  %v2041_v42 = vmul.f32 0.00390625, %v2039_v40 }
 0x48e   : > { %v2043_v43 = vsub.f32 %v2041_v42, %v2042_v41 }
 0x490   : > { %v2044_v44 = vmax.f32 %v2043_v43, 0.0 }
 0x492   : > { %v2045_v45 = vadd.f32 1e-05, %v2044_v44 }
 0x494   : > { %2197 = vrsqrt.f32 %v2045_v45 }
 0x4a1   : > { %v2198_v47 = vpop.eup %2197 }
 0x4a2   : > { %v2047_v48 = vmul.f32 %v2198_v47, %v1207_v46 }
 0x4a4   : > { %2052 = vperm.xlu0 %2193, %v2047_v48   ;;  %v2048_v50 = vmul.f32 %v2047_v48, %v2040_v39 }
 0x4a6   : > { %v2049_v51 = vsub.f32 %v1208_v49, %v2048_v50 }
 0x4a8   : > { %2059 = vperm.xlu1 %2194, %v2049_v51  }
 0x51f   : > { %v2053_v52 = vpop.permute.xlu0 %2052 }
 0x520   : > { %v2055_v53 = vmul.f32 %v2053_v52, %v2030_v31  ;;  %v2056_v54 = vmul.f32 %v2053_v52, %v2031_v33 }
 0x523   : > { %v2060_v55 = vpop.permute.xlu1 %2059 }
 0x524   : > { %v2062_v56 = vadd.f32 %v2060_v55, %v2055_v53  ;;  %v2063_v57 = vadd.f32 %v2060_v55, %v2056_v54 }
 0x526   : > { %v2064_v58 = vmax.f32 %v2062_v56, 0.0  ;;  %v2065_v59 = vmax.f32 %v2063_v57, 0.0 }
 0x528   : > { %v2068_v60 = vadd.f32 %v2064_v58, %v2290_v7  ;;  %v2069_v61 = vadd.f32 %v2065_v59, %v2300_v11 }
 0x52a   : > { %2070 = vst [vmem:[%s305_s20] sm:$0xff] %v2068_v60  ;;  %2071 = vst [vmem:[%s305_s20 + $0x8] sm:$0xff] %v2069_v61 }
 0x52b PF: > { %s18_s27 = sadd.s32 1, %s2205_s27  }
 0x52c   : > { %p15_p4 = scmp.ge.s32.totalorder %s18_s27, 4  }
 0x52e   :  { %17 = sbr.rel (!%p15_p4) target bundleno = 1 (0x1), region = 99 }

</bundles_post_ra>
